<compile_context>
chip_gen: v7x
topology: tpu7x:2x2x1
jax: 0.10.0
libtpu: 0.0.40
codegen_flags: <defaults>
</compile_context>

<pallas_src>
import functools

import jax
import jax.numpy as jnp
from jax.experimental import pallas as pl
from jax.experimental.pallas import tpu as pltpu

_MIB = 1024 * 1024


def _vmem_capacity_bytes() -> int:
    """Per-TensorCore VMEM; conservative (v7x-sized) fallback if query unavailable."""
    try:
        return int(pltpu.get_tpu_info().vmem_capacity_bytes)
    except Exception:
        return 64 * _MIB


# --------------------------------------------------------------------------- #
# Fused single-pass kernel: whole (bn, C, HW) slab per invocation / grid step.
# --------------------------------------------------------------------------- #
def _ca_fused_kernel(x_ref, w1t_ref, b1_ref, w2_ref, b2_ref, o_ref, *, inv_hw):
    # x_ref / o_ref: (bn, C, HW); weight blocks are tiny and fully resident.
    x = x_ref[...]
    # AdaptiveAvgPool2d(1): mean over all spatial positions, per channel (f32 acc).
    pooled = jnp.sum(x.astype(jnp.float32), axis=-1, keepdims=True) * inv_hw   # (bn,C,1)
    # Conv1x1(C->MID)+ReLU then Conv1x1(MID->C)+Sigmoid, as VPU broadcast-muls +
    # XLU reductions (no lane-width-MID MXU matvec), vectorized over the batch.
    h = jnp.sum(w1t_ref[...][None, :, :] * pooled, axis=1, keepdims=True)      # (bn,1,MID)
    h = jnp.maximum(h + b1_ref[...][None, :, :], 0.0)
    y = jnp.sum(w2_ref[...][None, :, :] * h, axis=-1, keepdims=True)           # (bn,C,1)
    y = jax.nn.sigmoid(y + b2_ref[...][None, :, :])
    # Cast the gate to the input dtype so the big multiply stays in bf16 on v6e/v7x.
    o_ref[...] = (x * y.astype(x.dtype)).astype(o_ref.dtype)


# --------------------------------------------------------------------------- #
# Two-pass HW-tiled fallback (large feature maps).
# --------------------------------------------------------------------------- #
def _ca_pool_kernel(x_ref, psum_ref, acc_ref, *, hw, tile):
    # grid = (split, N, n_half); x_ref: (C, tile); psum_ref / acc_ref: (C, 1) f32.
    k = pl.program_id(2)

    @pl.when(k == 0)
    def _init():
        acc_ref[...] = jnp.zeros_like(acc_ref)

    # Global (un-clamped) tile index. Lanes >= (hw - start) fall outside the real
    # feature map (ragged last tile, or a clamped duplicate tile) -> masked out,
    # so no HBM-side zero padding of x is needed.
    gk = pl.program_id(0) * pl.num_programs(2) + k
    valid = hw - gk * tile
    lane = jax.lax.broadcasted_iota(jnp.int32, x_ref.shape, x_ref.ndim - 1)
    xv = jnp.where(lane < valid, x_ref[...].astype(jnp.float32), 0.0)
    acc_ref[...] += jnp.sum(xv, axis=-1, keepdims=True)

    @pl.when(k == pl.num_programs(2) - 1)
    def _finalize():
        psum_ref[...] = acc_ref[...]


def _ca_scale_kernel(x_ref, gate_ref, o_ref):
    # x_ref: (C, tile); gate_ref: (C, 1) already in x's dtype (bf16 stays bf16).
    # OOB lanes of the ragged edge block are dropped by the pipeline on store.
    o_ref[...] = (x_ref[...] * gate_ref[...]).astype(o_ref.dtype)


# --------------------------------------------------------------------------- #
# Wrapper
# --------------------------------------------------------------------------- #
def channel_attention(x_nchw, w1, b1, w2, b2, *,
                      vmem_budget_bytes=None, force_hw_tile=None):
    """RCAN ChannelAttention forward on TPU.

    x_nchw: (N, C, H, W). w1: (MID, C) [Conv2d(C,MID,1) weight], b1: (MID,),
    w2: (C, MID) [Conv2d(MID,C,1) weight], b2: (C,). Returns (N, C, H, W).
    """
    N, C, H, W = x_nchw.shape
    HW = H * W
    MID = w1.shape[0]
    dtype = x_nchw.dtype
    itemsize = jnp.dtype(dtype).itemsize

    if vmem_budget_bytes is None:
        cap = _vmem_capacity_bytes()
        # Plan against (capacity - headroom); on 128-MiB parts (v5e/v6e) this keeps
        # more shapes on the 1-read/1-write fused path.
        vmem_budget_bytes = max(cap - 16 * _MIB, 8 * _MIB)

    x = x_nchw.reshape(N, C, HW)
    w1f = jnp.asarray(w1, jnp.float32)                 # (MID, C)
    b1f = jnp.asarray(b1, jnp.float32)                 # (MID,)
    w2f = jnp.asarray(w2, jnp.float32)                 # (C, MID)
    b2f = jnp.asarray(b2, jnp.float32)                 # (C,)
    inv_hw = 1.0 / float(HW)                           # true mean, tiling-independent

    slab_bytes = C * HW * itemsize
    fused_ce = pl.CostEstimate(
        flops=int(N * (2 * C * HW + 4 * MID * C)),
        transcendentals=int(N * C),
        bytes_accessed=int(2 * N * C * HW * itemsize),
    )

    if force_hw_tile is None:
        kernel = functools.partial(_ca_fused_kernel, inv_hw=inv_hw)
        w1t = w1f.T                                    # (C, MID): conv #1 on the VPU
        b1r = b1f.reshape(1, MID)
        b2c = b2f.reshape(C, 1)

        if N == 1 and 2 * slab_bytes <= vmem_budget_bytes:
            # ---- gridless whole-slab fast path: single-buffered (2x slab) ----
            out = pl.pallas_call(
                kernel,
                out_shape=jax.ShapeDtypeStruct((N, C, HW), dtype),
                in_specs=[pl.BlockSpec(memory_space=pltpu.MemorySpace.VMEM)] * 5,
                out_specs=pl.BlockSpec(memory_space=pltpu.MemorySpace.VMEM),
                compiler_params=pltpu.CompilerParams(
                    vmem_limit_bytes=int(max(2 * slab_bytes + 4 * _MIB, 32 * _MIB)),
                ),
                cost_estimate=fused_ce,
            )(x, w1t, b1r, w2f, b2c)
            return out.reshape(N, C, H, W)

        if N >= 2 and 4 * slab_bytes <= vmem_budget_bytes:
            # ---- pipelined fast path: >= 2 grid steps so the "parallel" axis ----
            # ---- can shard across v7x's two TensorCores.                     ----
            bn = 1
            for cand in range(min(N // 2, 8), 0, -1):
                if N % cand == 0 and 4 * cand * slab_bytes <= vmem_budget_bytes:
                    bn = cand
                    break
            vmem_limit = int(max(4 * bn * slab_bytes + 4 * _MIB, 32 * _MIB))
            out = pl.pallas_call(
                kernel,
                out_shape=jax.ShapeDtypeStruct((N, C, HW), dtype),
                grid_spec=pltpu.PrefetchScalarGridSpec(
                    num_scalar_prefetch=0,
                    grid=(N // bn,),
                    in_specs=[
                        pl.BlockSpec((bn, C, HW), lambda n: (n, 0, 0)),
                        pl.BlockSpec((C, MID), lambda n: (0, 0)),
                        pl.BlockSpec((1, MID), lambda n: (0, 0)),
                        pl.BlockSpec((C, MID), lambda n: (0, 0)),
                        pl.BlockSpec((C, 1), lambda n: (0, 0)),
                    ],
                    out_specs=pl.BlockSpec((bn, C, HW), lambda n: (n, 0, 0)),
                ),
                compiler_params=pltpu.CompilerParams(
                    dimension_semantics=("parallel",),
                    vmem_limit_bytes=vmem_limit,
                ),
                cost_estimate=fused_ce,
            )(x, w1t, b1r, w2f, b2c)
            return out.reshape(N, C, H, W)

    # ---------------- two-pass HW-tiled fallback (no HBM pad/slice) ----------------
    if force_hw_tile is not None:
        tile = int(force_hw_tile)
    else:
        tile = int(vmem_budget_bytes // (4 * C * itemsize))   # 4 bufs of (C, tile) in pass 2
        tile = min(tile, 8192)                                 # diminishing returns beyond
    tile = max(128, (tile // 128) * 128)                       # lane-dense, unmasked vst
    tile = min(tile, max(128, ((HW + 127) // 128) * 128))
    n_tiles = pl.cdiv(HW, tile)

    # Split the HW-tile range over a leading "parallel" axis so both v7x TensorCores
    # get pooling work even when N == 1 (sequential / free on v5e/v6e).
    split = 2 if n_tiles >= 2 else 1
    n_half = pl.cdiv(n_tiles, split)
    need_clamp = split * n_half > n_tiles

    def x_pool_map(s, n, k):
        gk = s * n_half + k
        if need_clamp:
            gk = jnp.minimum(gk, n_tiles - 1)   # duplicate tile is fully masked in-kernel
        return (n, 0, gk)

    tiled_limit = int(max(4 * C * tile * itemsize + 4 * _MIB, 32 * _MIB))

    # Pass 1: per-channel partial sums (ragged tail masked in-kernel).
    psum = pl.pallas_call(
        functools.partial(_ca_pool_kernel, hw=HW, tile=tile),
        out_shape=jax.ShapeDtypeStruct((split * N, C, 1), jnp.float32),
        grid_spec=pltpu.PrefetchScalarGridSpec(
            num_scalar_prefetch=0,
            grid=(split, N, n_half),                            # reduction axis last
            in_specs=[pl.BlockSpec((None, C, tile), x_pool_map)],
            out_specs=pl.BlockSpec((None, C, 1), lambda s, n, k: (s * N + n, 0, 0)),
            scratch_shapes=[pltpu.VMEM((C, 1), jnp.float32)],
        ),
        compiler_params=pltpu.CompilerParams(
            dimension_semantics=("parallel", "parallel", "arbitrary"),
            vmem_limit_bytes=tiled_limit,
        ),
        cost_estimate=pl.CostEstimate(
            flops=int(2 * N * C * HW),
            transcendentals=0,
            bytes_accessed=int(N * C * HW * itemsize),
        ),
    )(x)

    # Tiny per-image gate (2 matvecs + sigmoid) in plain JAX between the passes.
    pooled = psum.reshape(split, N, C).sum(axis=0) * inv_hw            # (N, C)
    hidden = jnp.maximum(pooled @ w1f.T + b1f, 0.0)                    # (N, MID)
    gate = jax.nn.sigmoid(hidden @ w2f.T + b2f)                        # (N, C)
    gate = gate.astype(dtype)[:, :, None]                              # (N, C, 1)

    # Pass 2: mem-bound broadcast multiply; both axes "parallel" (megacore on v7x).
    out = pl.pallas_call(
        _ca_scale_kernel,
        out_shape=jax.ShapeDtypeStruct((N, C, HW), dtype),
        grid_spec=pltpu.PrefetchScalarGridSpec(
            num_scalar_prefetch=0,
            grid=(N, n_tiles),
            in_specs=[
                pl.BlockSpec((None, C, tile), lambda n, k: (n, 0, k)),
                pl.BlockSpec((None, C, 1), lambda n, k: (n, 0, 0)),
            ],
            out_specs=pl.BlockSpec((None, C, tile), lambda n, k: (n, 0, k)),
        ),
        compiler_params=pltpu.CompilerParams(
            dimension_semantics=("parallel", "parallel"),
            vmem_limit_bytes=tiled_limit,
        ),
        cost_estimate=pl.CostEstimate(
            flops=int(N * C * HW),
            transcendentals=0,
            bytes_accessed=int(2 * N * C * HW * itemsize),
        ),
    )(x, gate)

    return out.reshape(N, C, H, W)


def reference(x, w1, b1, w2, b2):
    # Pure-JAX reference mirroring the PyTorch module semantics.
    pooled = jnp.mean(x, axis=(2, 3), keepdims=True)                 # (N,C,1,1)
    h = jnp.einsum("oc,ncij->noij", w1, pooled) + b1[None, :, None, None]
    h = jnp.maximum(h, 0.0)
    y = jnp.einsum("om,nmij->noij", w2, h) + b2[None, :, None, None]
    return x * jax.nn.sigmoid(y)


if __name__ == "__main__":
    # num_feat=64, squeeze_factor=16 -> MID=4; H=W=13 gives a non-128-multiple
    # spatial extent so the un-padded ragged-edge handling is exercised.
    N, C, H, W = 2, 64, 13, 13
    SQUEEZE = 16
    MID = C // SQUEEZE

    key = jax.random.PRNGKey(0)
    kx, k1, k2, k3, k4, kx2 = jax.random.split(key, 6)

    x = jax.random.normal(kx, (N, C, H, W), dtype=jnp.float32)
    # Conv2d(C, MID, 1): weight (MID, C, 1, 1) -> stored as (MID, C); bias (MID,)
    w1 = jax.random.normal(k1, (MID, C), dtype=jnp.float32) * 0.1
    b1 = jax.random.normal(k2, (MID,), dtype=jnp.float32) * 0.1
    # Conv2d(MID, C, 1): weight (C, MID, 1, 1) -> stored as (C, MID); bias (C,)
    w2 = jax.random.normal(k3, (C, MID), dtype=jnp.float32) * 0.1
    b2 = jax.random.normal(k4, (C,), dtype=jnp.float32) * 0.1

    ref = reference(x, w1, b1, w2, b2)

    # 1) Fused fast path, N >= 2: pipelined grid with >= 2 "parallel" steps.
    out = jax.block_until_ready(channel_attention(x, w1, b1, w2, b2))
    assert out.shape == (N, C, H, W)
    assert jnp.allclose(out, ref, atol=1e-5, rtol=1e-5), "fused grid path mismatch"

    # 2) Fused fast path, N == 1: gridless single-buffered whole-slab kernel.
    out1 = jax.block_until_ready(channel_attention(x[:1], w1, b1, w2, b2))
    assert jnp.allclose(out1, ref[:1], atol=1e-5, rtol=1e-5), "gridless path mismatch"

    # 3) Two-pass fallback with a ragged last tile (HW = 169, tile = 128).
    out_t = jax.block_until_ready(
        channel_attention(x, w1, b1, w2, b2, force_hw_tile=128))
    assert out_t.shape == (N, C, H, W)
    assert jnp.allclose(out_t, ref, atol=1e-5, rtol=1e-5), "tiled path mismatch"

    # 4) Fallback with an odd tile count (clamped duplicate tile is fully masked).
    x3 = jax.random.normal(kx2, (1, C, 17, 17), dtype=jnp.float32)
    ref3 = reference(x3, w1, b1, w2, b2)
    out3 = jax.block_until_ready(
        channel_attention(x3, w1, b1, w2, b2, force_hw_tile=128))
    assert jnp.allclose(out3, ref3, atol=1e-5, rtol=1e-5), "ragged split path mismatch"

    print("KERNEL_OK")
</pallas_src>

<mosaic_0001>
module attributes {stable_mosaic.version = 11 : i64} {
  func.func @_ca_fused_kernel(%arg0: i32, %arg1: memref<1x64x169xf32, #tpu.memory_space<vmem>>, %arg2: memref<64x4xf32, #tpu.memory_space<vmem>>, %arg3: memref<1x4xf32, #tpu.memory_space<vmem>>, %arg4: memref<64x4xf32, #tpu.memory_space<vmem>>, %arg5: memref<64x1xf32, #tpu.memory_space<vmem>>, %arg6: memref<1x64x169xf32, #tpu.memory_space<vmem>>) attributes {dimension_semantics = [#tpu.dimension_semantics<parallel>], iteration_bounds = array<i64: 2>, scalar_prefetch = 0 : i64, scratch_operands = 0 : i64, tpu.core_type = #tpu.core_type<tc>, window_params = [{transform_indices = @transform_0, window_bounds = array<i64: 1, 64, 169>}, {pipeline_mode = #tpu.pipeline_mode<synchronous>, transform_indices = @transform_1, window_bounds = array<i64: 64, 4>}, {pipeline_mode = #tpu.pipeline_mode<synchronous>, transform_indices = @transform_2, window_bounds = array<i64: 1, 4>}, {pipeline_mode = #tpu.pipeline_mode<synchronous>, transform_indices = @transform_3, window_bounds = array<i64: 64, 4>}, {pipeline_mode = #tpu.pipeline_mode<synchronous>, transform_indices = @transform_4, window_bounds = array<i64: 64, 1>}, {transform_indices = @transform_5, window_bounds = array<i64: 1, 64, 169>}]} {
    %c0 = arith.constant 0 : index
    %c0_0 = arith.constant 0 : index
    %c0_1 = arith.constant 0 : index
    %0 = vector.load %arg1[%c0, %c0_0, %c0_1] : memref<1x64x169xf32, #tpu.memory_space<vmem>>, vector<1x64x169xf32>
    %cst = arith.constant dense<0.000000e+00> : vector<1x64xf32>
    %1 = vector.multi_reduction <add>, %0, %cst [2] : vector<1x64x169xf32> to vector<1x64xf32>
    %2 = vector.shape_cast %1 : vector<1x64xf32> to vector<1x64x1xf32>
    %cst_2 = arith.constant 5.917160e-03 : f32
    %3 = vector.broadcast %cst_2 : f32 to vector<1x64x1xf32>
    %4 = arith.mulf %2, %3 : vector<1x64x1xf32>
    %c0_3 = arith.constant 0 : index
    %c0_4 = arith.constant 0 : index
    %5 = vector.load %arg2[%c0_3, %c0_4] : memref<64x4xf32, #tpu.memory_space<vmem>>, vector<64x4xf32>
    %6 = vector.shape_cast %5 : vector<64x4xf32> to vector<1x64x4xf32>
    %7 = vector.broadcast %4 : vector<1x64x1xf32> to vector<1x64x4xf32>
    %8 = arith.mulf %6, %7 : vector<1x64x4xf32>
    %cst_5 = arith.constant dense<0.000000e+00> : vector<1x4xf32>
    %9 = vector.multi_reduction <add>, %8, %cst_5 [1] : vector<1x64x4xf32> to vector<1x4xf32>
    %10 = vector.shape_cast %9 : vector<1x4xf32> to vector<1x1x4xf32>
    %c0_6 = arith.constant 0 : index
    %c0_7 = arith.constant 0 : index
    %11 = vector.load %arg3[%c0_6, %c0_7] : memref<1x4xf32, #tpu.memory_space<vmem>>, vector<1x4xf32>
    %12 = vector.shape_cast %11 : vector<1x4xf32> to vector<1x1x4xf32>
    %13 = arith.addf %10, %12 : vector<1x1x4xf32>
    %cst_8 = arith.constant 0.000000e+00 : f32
    %14 = vector.broadcast %cst_8 : f32 to vector<1x1x4xf32>
    %15 = arith.maximumf %13, %14 : vector<1x1x4xf32>
    %c0_9 = arith.constant 0 : index
    %c0_10 = arith.constant 0 : index
    %16 = vector.load %arg4[%c0_9, %c0_10] : memref<64x4xf32, #tpu.memory_space<vmem>>, vector<64x4xf32>
    %17 = vector.shape_cast %16 : vector<64x4xf32> to vector<1x64x4xf32>
    %18 = vector.broadcast %15 : vector<1x1x4xf32> to vector<1x64x4xf32>
    %19 = arith.mulf %17, %18 : vector<1x64x4xf32>
    %cst_11 = arith.constant dense<0.000000e+00> : vector<1x64xf32>
    %20 = vector.multi_reduction <add>, %19, %cst_11 [2] : vector<1x64x4xf32> to vector<1x64xf32>
    %21 = vector.shape_cast %20 : vector<1x64xf32> to vector<1x64x1xf32>
    %c0_12 = arith.constant 0 : index
    %c0_13 = arith.constant 0 : index
    %22 = vector.load %arg5[%c0_12, %c0_13] : memref<64x1xf32, #tpu.memory_space<vmem>>, vector<64x1xf32>
    %23 = vector.shape_cast %22 : vector<64x1xf32> to vector<1x64x1xf32>
    %24 = arith.addf %21, %23 : vector<1x64x1xf32>
    %25 = arith.negf %24 : vector<1x64x1xf32>
    %26 = math.exp %25 : vector<1x64x1xf32>
    %cst_14 = arith.constant 1.000000e+00 : f32
    %27 = vector.broadcast %cst_14 : f32 to vector<1x64x1xf32>
    %28 = arith.addf %27, %26 : vector<1x64x1xf32>
    %29 = arith.divf %27, %28 : vector<1x64x1xf32>
    %30 = vector.broadcast %29 : vector<1x64x1xf32> to vector<1x64x169xf32>
    %31 = arith.mulf %0, %30 : vector<1x64x169xf32>
    %c0_15 = arith.constant 0 : index
    %c0_16 = arith.constant 0 : index
    %c0_17 = arith.constant 0 : index
    %32 = vector.load %arg6[%c0_15, %c0_16, %c0_17] : memref<1x64x169xf32, #tpu.memory_space<vmem>>, vector<1x64x169xf32>
    tpu.vector_store %arg6[%c0_15, %c0_16, %c0_17], %31 {strides = array<i32>} : memref<1x64x169xf32, #tpu.memory_space<vmem>>, vector<1x64x169xf32>,
    return
  }
  func.func @transform_0(%arg0: i32) -> (i32, i32, i32) {
    %c0_i32 = arith.constant 0 : i32
    %c0_i32_0 = arith.constant 0 : i32
    %c0_i32_1 = arith.constant 0 : i32
    return %arg0, %c0_i32, %c0_i32_0 : i32, i32, i32
  }
  func.func @transform_1(%arg0: i32) -> (i32, i32) {
    %c0_i32 = arith.constant 0 : i32
    %c0_i32_0 = arith.constant 0 : i32
    %c0_i32_1 = arith.constant 0 : i32
    return %c0_i32, %c0_i32_0 : i32, i32
  }
  func.func @transform_2(%arg0: i32) -> (i32, i32) {
    %c0_i32 = arith.constant 0 : i32
    %c0_i32_0 = arith.constant 0 : i32
    %c0_i32_1 = arith.constant 0 : i32
    return %c0_i32, %c0_i32_0 : i32, i32
  }
  func.func @transform_3(%arg0: i32) -> (i32, i32) {
    %c0_i32 = arith.constant 0 : i32
    %c0_i32_0 = arith.constant 0 : i32
    %c0_i32_1 = arith.constant 0 : i32
    return %c0_i32, %c0_i32_0 : i32, i32
  }
  func.func @transform_4(%arg0: i32) -> (i32, i32) {
    %c0_i32 = arith.constant 0 : i32
    %c0_i32_0 = arith.constant 0 : i32
    %c0_i32_1 = arith.constant 0 : i32
    return %c0_i32, %c0_i32_0 : i32, i32
  }
  func.func @transform_5(%arg0: i32) -> (i32, i32, i32) {
    %c0_i32 = arith.constant 0 : i32
    %c0_i32_0 = arith.constant 0 : i32
    %c0_i32_1 = arith.constant 0 : i32
    return %arg0, %c0_i32, %c0_i32_0 : i32, i32, i32
  }
}

</mosaic_0001>

<bundles_post_ra>
// kernel: tpu_custom_call.1
= control target key start
LH: loop header
LB: loop body
LE: loop exit
PB: predicated region body
PF: predicated region fallthrough
CT: control target
= control target key end

     0   :  { %10 = vsyncpa [#allocation3], 0  ;;  %s1226_s0 = inlined_call_operand.hbm [shape: f32[2,64,169], index: 0, kind: input, shape index: {}]   ;;  %s1227_s1 = inlined_call_operand.vmem [shape: f32[64,4], index: 1, kind: input, shape index: {}]   ;;  %s1228_s2 = inlined_call_operand.vmem [shape: f32[1,4], index: 2, kind: input, shape index: {}]   ;;  %s1229_s3 = inlined_call_operand.vmem [shape: f32[64,4], index: 3, kind: input, shape index: {}]   ;;  %s1230_s4 = inlined_call_operand.vmem [shape: f32[64,1], index: 4, kind: input, shape index: {}]   ;;  %s1231_s5 = inlined_call_operand.hbm [shape: f32[2,64,169], index: 5, kind: output, shape index: {}]  }
   0x1   :  { %12 = vsyncpa [#allocation3 + $0x1], 0 }
   0x2   :  { %13 = vsyncpa [#allocation4], 0 }
   0x3   :  { %15 = vsyncpa [#allocation4 + $0x1], 0  ;;  %s852_s18 = smov 0   ;;  %s854_s19 = smov 0  }
   0x4   :  { %s856_s20 = smov 0   ;;  %s858_s21 = smov 0  }
   0x5 LB: > { %s873_s22 = sadd.s32 4294967295, %s813_s21   ;;  %s608_s23 = sadd.s32 4294967294, %s813_s21   ;;  %s813_s21 = sphi %s858_s21, %s1244_s21   ;;  %s809_s20 = sphi %s856_s20, %s1243_s20   ;;  %s805_s19 = sphi %s854_s19, %s1242_s19   ;;  %s801_s18 = sphi %s852_s18, %s1241_s18  }
   0x6   : > { %s877_s24 = sadd.s32 1, %s813_s21   ;;  %s28_s25 = sadd.s32 1, %s809_s20 }
   0x7   : > { %s25_s26 = ssub.s32 %s813_s21, %s877_s24  ;;  %p35_p0 = scmp.ne.s32.totalorder %s809_s20, %s805_s19 }
   0x8   : > { %p26_p1 = scmp.eq.s32.totalorder %s25_s26, 0  ;;  %p36_p2 = scmp.eq.s32.totalorder %s813_s21, 0 }
   0x9   : > { %p41_p3 = scmp.ne.s32.totalorder %s805_s19, %s801_s18  ;;  %p42_p4 = scmp.eq.s32.totalorder %s873_s22, 0 }
   0xa   : > { %s889_s27 = scalar_select %p26_p1, %s809_s20, %s28_s25  }
   0xb   : > { %p891_p5 = por %p36_p2, %p35_p0  ;;  %p895_p6 = por %p42_p4, %p41_p3 }
   0xc   : > { %p149_p7 = scmp.eq.s32.totalorder %s873_s22, 1  ;;  %p155_p8 = scmp.eq.s32.totalorder %s608_s23, 1 }
   0xd   : > { %p644_p10 = scmp.lt.s32.totalorder %s813_s21, 2  ;;  %s187_s7 = sand.u32 1, %s809_s20  }
   0xe   : > { %p902_p11 = por %p149_p7, %p35_p0  ;;  %p906_p12 = por %p155_p8, %p41_p3 }
   0xf   : > { %s630_s8 = sshll.u32 %s813_s21, 11  ;;  %s611_s9 = sshll.u32 %s187_s7, 7 }
  0x10   : > { %s1235_s30 = scalar_select %p902_p11, 1, 0 }
  0x11   : > { %s1236_s6 = scalar_select %p906_p12, 1, 0 }
  0x12   : > { %s915_s12 = scalar_lea.hbm %s1226_s0, %s630_s8  ;;  %s191_s13 = scalar_lea.vmem [#allocation2], %s611_s9 }
  0x13   : > { %s198_s14 = sshll.u32 %s191_s13, 4  ;;  %p919_p13 = pnand %p644_p10, %p891_p5  ;;  %s923_s14 = int_to_ptr.vmem [resolvable:$true] %s198_s14 }
  0x14   : > { %s925_s16 = scalar_lea.sflag [#allocation3], %s187_s7  ;;  %s717_s17 = scalar_lea.hbm %s915_s12, 2048 }
  0x15   : > { %p718_p0 = scmp.ne.s32.totalorder %s915_s12, %s717_s17  ;;  %p719_p1 = pneg %p919_p13 }
  0x16   : > { %s722_s26 = scalar_lea.hbm %s1226_s0, 4096  ;;  %p723_p4 = scmp.lt.u32.totalorder %s915_s12, %s1226_s0 }
  0x17   : > { %p720_p2 = pnand %p719_p1, %p718_p0  ;;  %p724_p5 = scmp.lt.u32.totalorder %s722_s26, %s717_s17 }
  0x18   : > { %p726_p8 = scmp.lt.u32.totalorder %s717_s17, %s915_s12 }
  0x19   : > { %p721_p3 = pneg %p720_p2  ;;  %p725_p7 = por %p724_p5, %p723_p4 }
  0x1b   : > { %p727_p10 = por %p726_p8, %p725_p7 }
  0x1d   : > { %p728_p9 = pnand %p727_p10, %p721_p3 }
  0x1f   : > { %731 = shalt.err (!%p728_p9)
}
  0x20   : > { %s732_s7 = scalar_lea.vmem %s923_s14, 2048  ;;  %s815_s9 = smov [#allocation2]  }
  0x21   : > { %p733_p0 = scmp.ne.s32.totalorder %s923_s14, %s732_s7  ;;  %s737_s10 = sshll.u32 %s815_s9, 4  ;;  %s738_s10 = int_to_ptr.vmem [resolvable:$false] %s737_s10 }
  0x22   : > { %s739_s11 = scalar_lea.vmem %s738_s10, 4096  ;;  %p740_p11 = scmp.lt.s32.totalorder %s923_s14, %s738_s10 }
  0x23   : > { %p735_p2 = pnand %p733_p0, %p719_p1  ;;  %p741_p4 = scmp.lt.s32.totalorder %s739_s11, %s732_s7 }
  0x25   : > { %p736_p12 = pneg %p735_p2  ;;  %p742_p5 = por %p741_p4, %p740_p11 }
  0x27   : > { %p743_p7 = pnand %p742_p5, %p736_p12 }
  0x29   : > { %746 = shalt.err (!%p743_p7)
}
  0x2a   : > { %s816_s13 = smov 256   ;;  %s817_s17 = smov 16  }
  0x2b   : > { %639 = dma.hbm_to_vmem [thread:$0]  (!%p919_p13), %s915_s12, 2048, %s923_s14, %s925_s16, %s816_s13, %s816_s13, %s817_s17  }
  0x2c   : > { %p614_p9 = scmp.ge.s32.totalorder %s813_s21, 1  ;;  %p206_p1 = scmp.lt.s32.totalorder %s813_s21, 3 }
  0x2e   : > { %p207_p3 = pnand %p614_p9, %p206_p1 }
  0x2f   : > { %s956_s23 = sand.u32 (!%p207_p3), 1, %s805_s19  }
  0x30   : > { %210 = sbr.rel (%p207_p3) target bundleno = 586 (0x24a), region = 40  ;;  %s615_s25 = sshll.u32 (!%p207_p3), %s956_s23, 7 }
  0x31   : > { %s213_s26 = scalar_lea.sflag (!%p207_p3), [#allocation3], %s956_s23  ;;  %s962_s28 = scalar_lea.vmem (!%p207_p3), [#allocation2], %s615_s25 }
  0x37   : > { %792 = dma.done.wait (%p895_p6), %s213_s26, 2048  }
  0x38   : > { %794 = vsyncadd (%p895_p6), %s213_s26, 4294965248  ;;  %vm259_vm0 = vcmask 334848   ;;  %v969_v0 = vld [vmem:[%s962_s28] sm:$0xff]  ;;  %v972_v1 = vld [vmem:[%s962_s28 + $0x8] sm:$0xff]  ;;  %vm316_vm1 = vcmask 31744   ;;  %s1137_s10 = scalar_lea.vmem [#allocation5], %s615_s25 }
  0x39   : > { %v975_v2 = vld [vmem:[%s962_s28 + $0x20] sm:$0xff]  ;;  %v260_v3 = vsel %vm259_vm0, %v972_v1, 0.0  ;;  %v980_v4 = vld [vmem:[%s962_s28 + $0x28] sm:$0xff]  ;;  %v983_v5 = vld [vmem:[%s962_s28 + $0x10] sm:$0xff]  ;;  %s631_s25 = sshll.u32 %s873_s22, 11  ;;  %s535_s11 = sshll.u32 %s1137_s10, 4  ;;  %s1177_s11 = int_to_ptr.vmem [resolvable:$true] %s535_s11 }
  0x3a   : > { %v986_v6 = vld [vmem:[%s962_s28 + $0x18] sm:$0xff]  ;;  %v261_v7 = vadd.f32 %v260_v3, %v969_v0  ;;  %v268_v8 = vsel %vm259_vm0, %v980_v4, 0.0  ;;  %v994_v10 = vld [vmem:[%s962_s28 + $0x30] sm:$0xff]  ;;  %v1003_v14 = vld [vmem:[%s962_s28 + $0x48] sm:$0xff]  ;;  %s1175_s26 = scalar_lea.hbm %s1231_s5, %s631_s25  ;;  %s522_s22 = scalar_lea.sflag [#allocation4], %s956_s23 }
  0x3b   : > { %v264_v9 = vsel %vm259_vm0, %v986_v6, 0.0  ;;  %v997_v11 = vld [vmem:[%s962_s28 + $0x38] sm:$0xff]  ;;  %v269_v12 = vadd.f32 %v268_v8, %v975_v2  ;;  %v1011_v18 = vld [vmem:[%s962_s28 + $0x40] sm:$0xff]  ;;  %v276_v19 = vsel %vm259_vm0, %v1003_v14, 0.0  ;;  %v1016_v20 = vld [vmem:[%s962_s28 + $0x50] sm:$0xff]  ;;  %p1238_p11 = scmp.ne.s32.totalorder %s1235_s30, 0 }
  0x3c   : > { %v272_v13 = vsel %vm259_vm0, %v997_v11, 0.0  ;;  %v1006_v15 = vld [vmem:[%s962_s28 + $0x58] sm:$0xff]  ;;  %262 = vadd.xlane.f32.xlu0 %v261_v7  ;;  %v265_v16 = vadd.f32 %v264_v9, %v983_v5  ;;  %v1021_v22 = vld [vmem:[%s962_s28 + $0x68] sm:$0xff]  ;;  %v277_v24 = vadd.f32 %v276_v19, %v1011_v18  ;;  %v1029_v26 = vld [vmem:[%s962_s28 + $0x60] sm:$0xff]  ;;  %s819_s29 = smov [#allocation5]  }
  0x3d   : > { %270 = vadd.xlane.f32.xlu1 %v269_v12  ;;  %v273_v17 = vadd.f32 %v272_v13, %v994_v10  ;;  %v280_v21 = vsel %vm259_vm0, %v1006_v15, 0.0  ;;  %v1024_v23 = vld [vmem:[%s962_s28 + $0x78] sm:$0xff]  ;;  %v284_v27 = vsel %vm259_vm0, %v1021_v22, 0.0  ;;  %v1034_v28 = vld [vmem:[%s962_s28 + $0x70] sm:$0xff]  ;;  %v300_v35 = vld [vmem:[%s1227_s1] sm:$0xff]  ;;  %s747_s28 = scalar_lea.vmem %s1177_s11, 2048 }
  0x3e   : > { %v281_v25 = vadd.f32 %v280_v21, %v1016_v20  ;;  %v288_v29 = vsel %vm259_vm0, %v1024_v23, 0.0  ;;  %v285_v30 = vadd.f32 %v284_v27, %v1029_v26  ;;  %v302_v37 = vld [vmem:[%s1227_s1 + $0x10] sm:$0xff]  ;;  %v301_v38 = vld [vmem:[%s1227_s1 + $0x8] sm:$0xff]  ;;  %v303_v42 = vld [vmem:[%s1227_s1 + $0x18] sm:$0xff]  ;;  %p748_p6 = scmp.ne.s32.totalorder %s1177_s11, %s747_s28  ;;  %s751_s12 = sshll.u32 %s819_s29, 4  ;;  %s752_s12 = int_to_ptr.vmem [resolvable:$false] %s751_s12 }
  0x3f   : > { %v289_v31 = vadd.f32 %v288_v29, %v1034_v28  ;;  %v304_v48 = vld [vmem:[%s1227_s1 + $0x20] sm:$0xff]  ;;  %v305_v53 = vld [vmem:[%s1227_s1 + $0x28] sm:$0xff]  ;;  %v306_v62 = vld [vmem:[%s1227_s1 + $0x30] sm:$0xff]  ;;  %s753_s14 = scalar_lea.vmem %s752_s12, 4096  ;;  %p754_p8 = scmp.lt.s32.totalorder %s1177_s11, %s752_s12 }
  0x40   : > { %266 = vadd.xlane.f32.xlu0 %v265_v16  ;;  %v307_v8 = vld [vmem:[%s1227_s1 + $0x38] sm:$0xff]  ;;  %p749_p12 = pnand %p748_p6, %p1238_p11  ;;  %p755_p10 = scmp.lt.s32.totalorder %s753_s14, %s747_s28 }
  0x41   : > { %274 = vadd.xlane.f32.xlu1 %v273_v17 }
  0x42   : > { %p750_p13 = pneg %p749_p12  ;;  %p756_p0 = por %p755_p10, %p754_p8 }
  0x44   : > { %278 = vadd.xlane.f32.xlu0 %v277_v24  ;;  %p757_p2 = pnand %p756_p0, %p750_p13 }
  0x45   : > { %282 = vadd.xlane.f32.xlu1 %v281_v25 }
  0x48   : > { %286 = vadd.xlane.f32.xlu0 %v285_v30 }
  0x49   : > { %290 = vadd.xlane.f32.xlu1 %v289_v31 }
  0xc9   : > { %v263_v32 = vpop.xlane.xlu0 %262 }
  0xca   : > { %v292_v33 = vmul.f32 0.00591716, %v263_v32  ;;  %v271_v34 = vpop.xlane.xlu1 %270 }
  0xcb   : > { %v294_v36 = vmul.f32 0.00591716, %v271_v34 }
  0xcc   : > { %v308_v40 = vmul.f32 %v300_v35, %v292_v33  ;;  %v349_v33 = vlaneseq }
  0xcd   : > { %v267_v39 = vpop.xlane.xlu0 %266  ;;  %v310_v45 = vmul.f32 %v302_v37, %v294_v36 }
  0xce   : > { %v293_v41 = vmul.f32 0.00591716, %v267_v39  ;;  %v275_v43 = vpop.xlane.xlu1 %274  ;;  %v317_v50 = vsel %vm316_vm1, %v308_v40, 0.0  ;;  %v350_v36 = vshrl.u32 %v349_v33, 7 }
  0xcf   : > { %v295_v44 = vmul.f32 0.00591716, %v275_v43  ;;  %v320_v57 = vsel %vm316_vm1, %v310_v45, 0.0  ;;  %v342_v43 = vld [vmem:[%s1229_s3 + $0x8] sm:$0xff] }
  0xd0   : > { %v309_v46 = vmul.f32 %v301_v38, %v293_v41  ;;  %v338_v38 = vld [vmem:[%s1228_s2] sm:$0x1]  ;;  %v351_v40 = vsub.s32 0, %v350_v36 }
  0xd1   : > { %v311_v47 = vmul.f32 %v303_v42, %v295_v44  ;;  %v279_v49 = vpop.xlane.xlu0 %278  ;;  %v341_v44 = vld [vmem:[%s1229_s3] sm:$0xff] }
  0xd2   : > { %v318_v51 = vsel %vm316_vm1, %v309_v46, 0.0  ;;  %v296_v52 = vmul.f32 0.00591716, %v279_v49  ;;  %v283_v54 = vpop.xlane.xlu1 %282  ;;  %v344_v46 = vld [vmem:[%s1229_s3 + $0x18] sm:$0xff]  ;;  %v389_v36 = vld [vmem:[%s1230_s4 + $0x20] sm:$0xff] }
  0xd3   : > { %v319_v55 = vadd.f32 %v318_v51, %v317_v50  ;;  %v297_v56 = vmul.f32 0.00591716, %v283_v54  ;;  %v322_v58 = vsel %vm316_vm1, %v311_v47, 0.0  ;;  %v343_v47 = vld [vmem:[%s1229_s3 + $0x10] sm:$0xff]  ;;  %v346_v54 = vld [vmem:[%s1229_s3 + $0x28] sm:$0xff] }
  0xd4   : > { %v312_v59 = vmul.f32 %v304_v48, %v296_v52 }
  0xd5   : > { %v321_v60 = vadd.f32 %v320_v57, %v319_v55  ;;  %v313_v61 = vmul.f32 %v305_v53, %v297_v56  ;;  %v287_v63 = vpop.xlane.xlu0 %286  ;;  %v345_v55 = vld [vmem:[%s1229_s3 + $0x20] sm:$0xff] }
  0xd6   : > { %v324_v3 = vsel %vm316_vm1, %v312_v59, 0.0  ;;  %v298_v7 = vmul.f32 0.00591716, %v287_v63  ;;  %v291_v9 = vpop.xlane.xlu1 %290 }
  0xd7   : > { %v323_v12 = vadd.f32 %v322_v58, %v321_v60  ;;  %v299_v13 = vmul.f32 0.00591716, %v291_v9  ;;  %v326_v16 = vsel %vm316_vm1, %v313_v61, 0.0  ;;  %v348_v60 = vld [vmem:[%s1229_s3 + $0x38] sm:$0xff]  ;;  %v347_v61 = vld [vmem:[%s1229_s3 + $0x30] sm:$0xff] }
  0xd8   : > { %v314_v17 = vmul.f32 %v306_v62, %v298_v7 }
  0xd9   : > { %v325_v19 = vadd.f32 %v324_v3, %v323_v12  ;;  %v315_v21 = vmul.f32 %v307_v8, %v299_v13  ;;  %v818_v12 = vmov 0   ;;  %v386_v13 = vld [vmem:[%s1230_s4 + $0x8] sm:$0xff] }
  0xda   : > { %v328_v24 = vsel %vm316_vm1, %v314_v17, 0.0  ;;  %684 = vset.pattern.permute.xlu1 %v818_v12  ;;  %683 = vset.pattern.permute.xlu0 %v818_v12 }
  0xdb   : > { %v327_v25 = vadd.f32 %v326_v16, %v325_v19  ;;  %v330_v27 = vsel %vm316_vm1, %v315_v21, 0.0  ;;  %v385_v16 = vld [vmem:[%s1230_s4] sm:$0xff] }
  0xdd   : > { %v329_v29 = vadd.f32 %v328_v24, %v327_v25  ;;  %v388_v25 = vld [vmem:[%s1230_s4 + $0x18] sm:$0xff] }
  0xdf   : > { %v331_v30 = vadd.f32 %v330_v27, %v329_v29  ;;  %v387_v27 = vld [vmem:[%s1230_s4 + $0x10] sm:$0xff] }
  0xe1   : > { %v332_v31 = vrot.slane %v331_v30, 4 }
  0xe3   : > { %v333_v32 = vadd.f32 %v332_v31, %v331_v30 }
  0xe5   : > { %v334_v34 = vrot.slane %v333_v32, 2 }
  0xe7   : > { %v335_v35 = vadd.f32 %v334_v34, %v333_v32 }
  0xe9   : > { %v336_v37 = vrot.slane %v335_v35, 1 }
  0xeb   : > { %v337_v39 = vadd.f32 %v336_v37, %v335_v35  ;;  %v390_v35 = vld [vmem:[%s1230_s4 + $0x28] sm:$0xff] }
  0xed   : > { %v339_v41 = vadd.f32 %v338_v38, %v337_v39 }
  0xef   : > { %v340_v42 = vmax.f32 %v339_v41, 0.0 }
  0xf1   : > { %v352_v45 = vrot.slane %v340_v42, %v351_v40 }
  0xf3   : > { %v354_v48 = vmul.f32 %v352_v45, %v342_v43  ;;  %v353_v49 = vmul.f32 %v352_v45, %v341_v44  ;;  %v356_v52 = vmul.f32 %v352_v45, %v344_v46  ;;  %v355_v53 = vmul.f32 %v352_v45, %v343_v47  ;;  %v391_v44 = vld [vmem:[%s1230_s4 + $0x30] sm:$0xff] }
  0xf4   : > { %v358_v58 = vmul.f32 %v352_v45, %v346_v54  ;;  %v357_v59 = vmul.f32 %v352_v45, %v345_v55  ;;  %v360_v3 = vmul.f32 %v352_v45, %v348_v60  ;;  %v359_v7 = vmul.f32 %v352_v45, %v347_v61 }
  0xf5   : > { %v364_v50 = vsel %vm316_vm1, %v354_v48, 0.0  ;;  %v361_v51 = vsel %vm316_vm1, %v353_v49, 0.0  ;;  %v370_v56 = vsel %vm316_vm1, %v356_v52, 0.0  ;;  %v367_v57 = vsel %vm316_vm1, %v355_v53, 0.0  ;;  %v392_v49 = vld [vmem:[%s1230_s4 + $0x38] sm:$0xff] }
  0xf6   : > { %365 = vadd.xlane.f32.xlu1 %v364_v50  ;;  %362 = vadd.xlane.f32.xlu0 %v361_v51  ;;  %v376_v62 = vsel %vm316_vm1, %v358_v58, 0.0  ;;  %v373_v63 = vsel %vm316_vm1, %v357_v59, 0.0  ;;  %v382_v8 = vsel %vm316_vm1, %v360_v3, 0.0  ;;  %v379_v9 = vsel %vm316_vm1, %v359_v7, 0.0 }
  0xfa   : > { %371 = vadd.xlane.f32.xlu1 %v370_v56  ;;  %368 = vadd.xlane.f32.xlu0 %v367_v57 }
  0xfe   : > { %377 = vadd.xlane.f32.xlu1 %v376_v62  ;;  %374 = vadd.xlane.f32.xlu0 %v373_v63 }
 0x102   : > { %383 = vadd.xlane.f32.xlu1 %v382_v8  ;;  %380 = vadd.xlane.f32.xlu0 %v379_v9 }
 0x183   : > { %v366_v17 = vpop.xlane.xlu1 %365  ;;  %v363_v19 = vpop.xlane.xlu0 %362 }
 0x184   : > { %v394_v21 = vadd.f32 %v386_v13, %v366_v17  ;;  %v393_v24 = vadd.f32 %v385_v16, %v363_v19 }
 0x186   : > { %v618_v29 = vmul.f32 -1.442695, %v394_v21  ;;  %v617_v30 = vmul.f32 -1.442695, %v393_v24 }
 0x187   : > { %v372_v31 = vpop.xlane.xlu1 %371  ;;  %v369_v32 = vpop.xlane.xlu0 %368 }
 0x188   : > { %685 = vpow2.f32 %v618_v29  ;;  %v396_v33 = vadd.f32 %v388_v25, %v372_v31  ;;  %v395_v34 = vadd.f32 %v387_v27, %v369_v32 }
 0x189   : > { %687 = vpow2.f32 %v617_v30 }
 0x18a   : > { %v620_v37 = vmul.f32 -1.442695, %v396_v33  ;;  %v619_v38 = vmul.f32 -1.442695, %v395_v34 }
 0x18b   : > { %v378_v39 = vpop.xlane.xlu1 %377  ;;  %v375_v40 = vpop.xlane.xlu0 %374 }
 0x18c   : > { %689 = vpow2.f32 %v620_v37  ;;  %v398_v41 = vadd.f32 %v390_v35, %v378_v39  ;;  %v397_v42 = vadd.f32 %v389_v36, %v375_v40 }
 0x18d   : > { %691 = vpow2.f32 %v619_v38 }
 0x18e   : > { %v621_v43 = vmul.f32 -1.442695, %v397_v42  ;;  %v622_v46 = vmul.f32 -1.442695, %v398_v41 }
 0x18f   : > { %v381_v45 = vpop.xlane.xlu0 %380  ;;  %v384_v50 = vpop.xlane.xlu1 %383 }
 0x190   : > { %693 = vpow2.f32 %v621_v43  ;;  %v399_v47 = vadd.f32 %v391_v44, %v381_v45  ;;  %v400_v54 = vadd.f32 %v392_v49, %v384_v50 }
 0x191   : > { %695 = vpow2.f32 %v622_v46 }
 0x192   : > { %v686_v48 = vpop.eup %685  ;;  %v623_v55 = vmul.f32 -1.442695, %v399_v47  ;;  %v624_v59 = vmul.f32 -1.442695, %v400_v54 }
 0x193   : > { %v688_v51 = vpop.eup %687  ;;  %v426_v52 = vadd.f32 1.0, %v686_v48 }
 0x194   : > { %v425_v53 = vadd.f32 1.0, %v688_v51 }
 0x195   : > { %697 = vrcp.f32 %v426_v52 }
 0x196   : > { %v690_v56 = vpop.eup %689  ;;  %699 = vrcp.f32 %v425_v53 }
 0x197   : > { %v692_v57 = vpop.eup %691  ;;  %701 = vpow2.f32 %v623_v55  ;;  %v428_v60 = vadd.f32 1.0, %v690_v56 }
 0x198   : > { %v427_v58 = vadd.f32 1.0, %v692_v57 }
 0x19a   : > { %703 = vrcp.f32 %v427_v58  ;;  %v694_v61 = vpop.eup %693 }
 0x19b   : > { %705 = vpow2.f32 %v624_v59  ;;  %v696_v62 = vpop.eup %695  ;;  %v429_v63 = vadd.f32 1.0, %v694_v61 }
 0x19c   : > { %707 = vrcp.f32 %v428_v60  ;;  %v430_v8 = vadd.f32 1.0, %v696_v62 }
 0x19d   : > { %709 = vrcp.f32 %v429_v63 }
 0x19e   : > { %711 = vrcp.f32 %v430_v8 }
 0x19f   : > { %v698_v3 = vpop.eup %697 }
 0x1a0   : > { %v700_v7 = vpop.eup %699  ;;  %456 = vperm.xlu1 %684, %v698_v3  }
 0x1a1   : > { %451 = vperm.xlu0 %683, %v700_v7   ;;  %v702_v9 = vpop.eup %701 }
 0x1a2   : > { %v431_v13 = vadd.f32 1.0, %v702_v9 }
 0x1a4   : > { %v704_v12 = vpop.eup %703  ;;  %713 = vrcp.f32 %v431_v13 }
 0x1a5   : > { %461 = vperm.xlu1 %684, %v704_v12   ;;  %v706_v16 = vpop.eup %705 }
 0x1a6   : > { %v708_v17 = vpop.eup %707  ;;  %v432_v19 = vadd.f32 1.0, %v706_v16 }
 0x1a7   : > { %v710_v21 = vpop.eup %709 }
 0x1a8   : > { %715 = vrcp.f32 %v432_v19  ;;  %v712_v24 = vpop.eup %711 }
 0x1a9   : > { %466 = vperm.xlu1 %684, %v708_v17  }
 0x1ad   : > { %471 = vperm.xlu1 %684, %v710_v21  }
 0x1ae   : > { %v714_v25 = vpop.eup %713 }
 0x1b1   : > { %476 = vperm.xlu1 %684, %v712_v24  }
 0x1b2   : > { %v716_v27 = vpop.eup %715 }
 0x1b5   : > { %481 = vperm.xlu1 %684, %v714_v25  }
 0x1b9   : > { %486 = vperm.xlu1 %684, %v716_v27  }
 0x21f   : > { %v457_v29 = vpop.permute.xlu1 %456 }
 0x220   : > { %v491_v30 = vmul.f32 %v457_v29, %v983_v5  ;;  %v492_v31 = vmul.f32 %v457_v29, %v986_v6  ;;  %v452_v32 = vpop.permute.xlu0 %451 }
 0x221   : > { %v489_v33 = vmul.f32 %v452_v32, %v969_v0  ;;  %v490_v34 = vmul.f32 %v452_v32, %v972_v1 }
 0x222   : > { %507 = vst [vmem:[%s1137_s10 + $0x10] sm:$0xff] %v491_v30  ;;  %508 = vst.msk [vmem:[%s1137_s10 + $0x18] sm:$0xff] %vm259_vm0, %v492_v31 }
 0x223   : > { %505 = vst [vmem:[%s1137_s10] sm:$0xff] %v489_v33  ;;  %506 = vst.msk [vmem:[%s1137_s10 + $0x8] sm:$0xff] %vm259_vm0, %v490_v34 }
 0x224   : > { %v462_v0 = vpop.permute.xlu1 %461 }
 0x225   : > { %v493_v1 = vmul.f32 %v462_v0, %v975_v2  ;;  %v494_v5 = vmul.f32 %v462_v0, %v980_v4 }
 0x227   : > { %509 = vst [vmem:[%s1137_s10 + $0x20] sm:$0xff] %v493_v1  ;;  %510 = vst.msk [vmem:[%s1137_s10 + $0x28] sm:$0xff] %vm259_vm0, %v494_v5 }
 0x228   : > { %v467_v6 = vpop.permute.xlu1 %466 }
 0x229   : > { %v495_v35 = vmul.f32 %v467_v6, %v994_v10  ;;  %v496_v36 = vmul.f32 %v467_v6, %v997_v11 }
 0x22b   : > { %511 = vst [vmem:[%s1137_s10 + $0x30] sm:$0xff] %v495_v35  ;;  %512 = vst.msk [vmem:[%s1137_s10 + $0x38] sm:$0xff] %vm259_vm0, %v496_v36 }
 0x22c   : > { %v472_v37 = vpop.permute.xlu1 %471 }
 0x22d   : > { %v497_v2 = vmul.f32 %v472_v37, %v1011_v18  ;;  %v498_v4 = vmul.f32 %v472_v37, %v1003_v14 }
 0x22f   : > { %513 = vst [vmem:[%s1137_s10 + $0x40] sm:$0xff] %v497_v2  ;;  %514 = vst.msk [vmem:[%s1137_s10 + $0x48] sm:$0xff] %vm259_vm0, %v498_v4 }
 0x230   : > { %v477_v38 = vpop.permute.xlu1 %476 }
 0x231   : > { %v499_v10 = vmul.f32 %v477_v38, %v1016_v20  ;;  %v500_v11 = vmul.f32 %v477_v38, %v1006_v15 }
 0x233   : > { %515 = vst [vmem:[%s1137_s10 + $0x50] sm:$0xff] %v499_v10  ;;  %516 = vst.msk [vmem:[%s1137_s10 + $0x58] sm:$0xff] %vm259_vm0, %v500_v11 }
 0x234   : > { %v482_v39 = vpop.permute.xlu1 %481 }
 0x235   : > { %v501_v40 = vmul.f32 %v482_v39, %v1029_v26  ;;  %v502_v14 = vmul.f32 %v482_v39, %v1021_v22 }
 0x237   : > { %517 = vst [vmem:[%s1137_s10 + $0x60] sm:$0xff] %v501_v40  ;;  %518 = vst.msk [vmem:[%s1137_s10 + $0x68] sm:$0xff] %vm259_vm0, %v502_v14 }
 0x238   : > { %v487_v18 = vpop.permute.xlu1 %486 }
 0x239   : > { %v503_v15 = vmul.f32 %v487_v18, %v1034_v28  ;;  %v504_v20 = vmul.f32 %v487_v18, %v1024_v23 }
 0x23b   : > { %519 = vst [vmem:[%s1137_s10 + $0x70] sm:$0xff] %v503_v15  ;;  %520 = vst.msk [vmem:[%s1137_s10 + $0x78] sm:$0xff] %vm259_vm0, %v504_v20 }
 0x23c   : > { %760 = shalt.err (!%p757_p2)
}
 0x23d   : > { %s761_s15 = scalar_lea.hbm %s1175_s26, 2048  ;;  %s765_s7 = scalar_lea.hbm %s1231_s5, 4096 }
 0x23e   : > { %p762_p4 = scmp.ne.s32.totalorder %s1175_s26, %s761_s15  ;;  %p766_p9 = scmp.lt.u32.totalorder %s1175_s26, %s1231_s5 }
 0x23f   : > { %p767_p1 = scmp.lt.u32.totalorder %s765_s7, %s761_s15  ;;  %p769_p6 = scmp.lt.u32.totalorder %s761_s15, %s1175_s26 }
 0x240   : > { %p763_p5 = pnand %p762_p4, %p1238_p11 }
 0x241   : > { %p768_p3 = por %p767_p1, %p766_p9 }
 0x242   : > { %p764_p7 = pneg %p763_p5 }
 0x243   : > { %p770_p12 = por %p769_p6, %p768_p3 }
 0x245   : > { %p771_p13 = pnand %p770_p12, %p764_p7 }
 0x247   : > { %774 = shalt.err (!%p771_p13)
}
 0x248   : > { %s820_s25 = smov 256   ;;  %s821_s13 = smov 16  }
 0x249   : > { %634 = dma.vmem_to_hbm [thread:$0]  (%p1238_p11), %s1177_s11, 2048, %s1175_s26, %s522_s22, %s820_s25, %s820_s25, %s821_s13  }
 0x24a PF: > { %s550_s17 = sand.u32 1, %s801_s18   ;;  %p1239_p8 = scmp.ne.s32.totalorder %s1236_s6, 0 }
 0x24b   : > { %p1240_p10 = scmp.ge.s32.totalorder %s813_s21, 2  ;;  %s551_s28 = scalar_lea.sflag [#allocation4], %s550_s17 }
 0x24d   : > { %p641_p0 = pnand %p1240_p10, %p1239_p8 }
 0x24f   : > { %796 = dma.done.wait (!%p641_p0), %s551_s28, 2048  }
 0x250   : > { %798 = vsyncadd (!%p641_p0), %s551_s28, 4294965248  ;;  %p18_p2 = scmp.ge.s32.totalorder %s877_s24, 4   ;;  %s1241_s18 = smov %s805_s19 }
 0x251   : > { %s1242_s19 = smov %s809_s20  ;;  %s1243_s20 = smov %s889_s27 }
 0x252   : > { %s1244_s21 = smov %s877_s24  ;;  %20 = sbr.rel (!%p18_p2) target bundleno = 5 (0x5), region = 85 }
 0x259   :  { %556 = vsyncpa [#allocation3], 1 }
 0x25a   :  { %558 = vsyncpa [#allocation3 + $0x1], 1 }
 0x25b   :  { %559 = vsyncpa [#allocation4], 1 }
 0x25c   :  { %561 = vsyncpa [#allocation4 + $0x1], 1 }

</bundles_post_ra>
